<compile_context>
chip_gen: v7x
topology: tpu7x:2x2x1
jax: 0.10.0
libtpu: 0.0.40
codegen_flags: <defaults>
</compile_context>

<pallas_src>
import functools

import jax
import jax.numpy as jnp
from jax.experimental import pallas as pl
from jax.experimental.pallas import tpu as pltpu


def _round_up(x, m):
    return ((x + m - 1) // m) * m


def _choose_time_chunk(T, Bp, Hp, I, budget_bytes=8 * 1024 * 1024):
    """Pick Tc so the Tc-dependent VMEM footprint stays under a small budget."""
    per_step = Bp * (3 * Hp * 4 + 2 * I * 2)   # xproj scratch (f32) + 2x bf16 x chunk
    return max(1, min(T, budget_bytes // max(per_step, 1)))


def _gru_kernel(x_ref,      # (Tc, Bp, I)   bf16  raw input chunk (time-major)
                w_i_ref,    # (I, 3Hp)      bf16  [Wir|Wiz|Win]^T fused
                b_i_ref,    # (1, 3Hp)      f32   (b_ir+b_hr | b_iz+b_hz | b_in)
                w_h_ref,    # (Hp, 3Hp)     bf16  [Whr|Whz|Whn]^T fused
                b_hn_ref,   # (1, Hp)       f32
                w_fc_ref,   # (Hp, Op)      bf16
                b_fc_ref,   # (1, Op)       f32
                out_ref,    # (Bp, Op)      f32   (written on last chunk only)
                h_ref,      # (Bp, Hp)      f32   VMEM scratch: carry across chunks
                xproj_ref,  # (Tc, Bp, 3Hp) f32   VMEM scratch: per-chunk projection
                *, seq_len, needs_mask, unroll):
    c = pl.program_id(0)
    tc, bp, in_dim = x_ref.shape
    hp = w_h_ref.shape[0]

    @pl.when(c == 0)
    def _():
        h_ref[...] = jnp.zeros_like(h_ref)

    # Per-chunk input projection: ONE MXU push, off the serial h-chain.
    x_chunk = x_ref[...].reshape(tc * bp, in_dim)                     # bf16
    proj = jnp.dot(x_chunk, w_i_ref[...], preferred_element_type=jnp.float32)
    xproj_ref[...] = (proj + b_i_ref[...]).reshape(tc, bp, 3 * hp)

    # Loop-invariant hoists (JAX does not CSE broadcast_in_dim inside loops).
    w_h = w_h_ref[...]                                      # bf16, loaded once
    b_hn = jnp.broadcast_to(b_hn_ref[...], (bp, hp))        # (Bp, Hp) f32

    def step(t, h):
        xp = xproj_ref[t]                                             # (Bp, 3Hp) f32
        hh = jnp.dot(h.astype(jnp.bfloat16), w_h,
                     preferred_element_type=jnp.float32)              # (Bp, 3Hp) f32
        # PyTorch GRU gate order (r, z, n); lane-aligned 128-wide slices.
        r = jax.nn.sigmoid(xp[:, :hp] + hh[:, :hp])
        z = jax.nn.sigmoid(xp[:, hp:2 * hp] + hh[:, hp:2 * hp])
        n = jnp.tanh(xp[:, 2 * hp:] + r * (hh[:, 2 * hp:] + b_hn))
        h_new = (1.0 - z) * n + z * h
        if needs_mask:   # static: only emitted when T % Tc != 0 (padded timesteps)
            h_new = jnp.where(c * tc + t < seq_len, h_new, h)
        return h_new

    h_ref[...] = jax.lax.fori_loop(0, tc, step, h_ref[...], unroll=unroll)

    @pl.when(c == pl.num_programs(0) - 1)
    def _():
        out_ref[...] = (jnp.dot(h_ref[...].astype(jnp.bfloat16), w_fc_ref[...],
                                preferred_element_type=jnp.float32)
                        + b_fc_ref[...])


def pack_params(params):
    """One-time weight packing: pad to lane-dense dims, fuse gates, cast MXU
    operands to bf16.  Run once at init, NOT inside the per-call forward."""
    I = params["w_ir"].shape[0]
    H = params["w_hr"].shape[0]
    O = params["w_fc"].shape[1]
    Hp = _round_up(H, 128)
    Op = _round_up(O, 128)

    def pad2(a, rows, cols):
        a = jnp.asarray(a, jnp.float32)
        return jnp.pad(a, ((0, rows - a.shape[0]), (0, cols - a.shape[1])))

    w_i = jnp.concatenate([pad2(params["w_ir"], I, Hp),
                           pad2(params["w_iz"], I, Hp),
                           pad2(params["w_in"], I, Hp)], axis=1)        # (I, 3Hp)
    b_i = jnp.concatenate([pad2(params["b_ir"] + params["b_hr"], 1, Hp),
                           pad2(params["b_iz"] + params["b_hz"], 1, Hp),
                           pad2(params["b_in"], 1, Hp)], axis=1)        # (1, 3Hp)
    w_h = jnp.concatenate([pad2(params["w_hr"], Hp, Hp),
                           pad2(params["w_hz"], Hp, Hp),
                           pad2(params["w_hn"], Hp, Hp)], axis=1)       # (Hp, 3Hp)
    return {
        "w_i": w_i.astype(jnp.bfloat16),
        "b_i": b_i,
        "w_h": w_h.astype(jnp.bfloat16),
        "b_hn": pad2(params["b_hn"], 1, Hp),
        "w_fc": pad2(params["w_fc"], Hp, Op).astype(jnp.bfloat16),
        "b_fc": pad2(params["b_fc"], 1, Op),
    }


@functools.partial(jax.jit, static_argnames=("output_size", "time_chunk"))
def gru_model_forward(x, packed, *, output_size, time_chunk=None):
    """x: (batch, seq, input_size) f32; packed: output of pack_params.
    Returns (batch, output_size) f32."""
    B, T, I = x.shape
    Hp = packed["w_h"].shape[0]
    Op = packed["w_fc"].shape[1]
    Bp = max(8, _round_up(B, 8))          # f32 sublane minimum: unmasked tiles

    Tc = time_chunk if time_chunk is not None else _choose_time_chunk(T, Bp, Hp, I)
    Tc = max(1, min(Tc, T))
    T_pad = _round_up(T, Tc)
    n_chunks = T_pad // Tc

    # Time-major, batch/time zero-padded, bf16 stream (the only O(T) HBM read).
    x_tm = jnp.transpose(x, (1, 0, 2)).astype(jnp.bfloat16)
    x_tm = jnp.pad(x_tm, ((0, T_pad - T), (0, Bp - B), (0, 0)))

    kernel = functools.partial(_gru_kernel,
                               seq_len=T,
                               needs_mask=(T_pad != T),
                               unroll=min(Tc, 8))

    # VMEM footprint -> limit with headroom, capped at 48 MiB (v7x has 64 MiB).
    chunk_bytes = (2 * Tc * Bp * I * 2            # double-buffered bf16 x chunks
                   + Tc * Bp * 3 * Hp * 4         # xproj scratch (f32)
                   + Bp * Hp * 4 + Bp * Op * 4    # h carry + output block
                   + (I + Hp) * 3 * Hp * 2 + Hp * Op * 2   # bf16 weights
                   + (3 * Hp + Hp + Op) * 4)      # f32 biases
    vmem_limit = int(min(max(4 * chunk_bytes, 16 * 1024 * 1024), 48 * 1024 * 1024))

    grid_spec = pltpu.PrefetchScalarGridSpec(
        num_scalar_prefetch=0,
        grid=(n_chunks,),
        in_specs=[
            pl.BlockSpec((Tc, Bp, I), lambda c: (c, 0, 0)),     # streamed x chunk
            pl.BlockSpec((I, 3 * Hp), lambda c: (0, 0)),        # w_i (VMEM-resident)
            pl.BlockSpec((1, 3 * Hp), lambda c: (0, 0)),        # b_i
            pl.BlockSpec((Hp, 3 * Hp), lambda c: (0, 0)),       # w_h
            pl.BlockSpec((1, Hp), lambda c: (0, 0)),            # b_hn
            pl.BlockSpec((Hp, Op), lambda c: (0, 0)),           # w_fc
            pl.BlockSpec((1, Op), lambda c: (0, 0)),            # b_fc
        ],
        out_specs=pl.BlockSpec((Bp, Op), lambda c: (0, 0)),     # resident accumulator
        scratch_shapes=[
            pltpu.VMEM((Bp, Hp), jnp.float32),                  # h carry across chunks
            pltpu.VMEM((Tc, Bp, 3 * Hp), jnp.float32),          # per-chunk projection
        ],
    )

    out_padded = pl.pallas_call(
        kernel,
        out_shape=jax.ShapeDtypeStruct((Bp, Op), jnp.float32),
        grid_spec=grid_spec,
        compiler_params=pltpu.CompilerParams(
            dimension_semantics=("arbitrary",),
            vmem_limit_bytes=vmem_limit),
    )(x_tm, packed["w_i"], packed["b_i"], packed["w_h"], packed["b_hn"],
      packed["w_fc"], packed["b_fc"])

    return out_padded[:B, :output_size]


def init_params(key, input_size, hidden_size, output_size):
    """Deterministic init matching PyTorch shapes (weights stored transposed)."""
    keys = jax.random.split(key, 15)
    k_gru = 1.0 / jnp.sqrt(hidden_size)
    k_fc = 1.0 / jnp.sqrt(hidden_size)

    def u(k, shape, scale):
        return jax.random.uniform(k, shape, jnp.float32, -scale, scale)

    return {
        # input->hidden weights, stored as (I, H) == W_i*^T
        "w_ir": u(keys[0], (input_size, hidden_size), k_gru),
        "w_iz": u(keys[1], (input_size, hidden_size), k_gru),
        "w_in": u(keys[2], (input_size, hidden_size), k_gru),
        # hidden->hidden weights, stored as (H, H) == W_h*^T
        "w_hr": u(keys[3], (hidden_size, hidden_size), k_gru),
        "w_hz": u(keys[4], (hidden_size, hidden_size), k_gru),
        "w_hn": u(keys[5], (hidden_size, hidden_size), k_gru),
        # biases as (1, H) for clean 2-D broadcasting
        "b_ir": u(keys[6], (1, hidden_size), k_gru),
        "b_iz": u(keys[7], (1, hidden_size), k_gru),
        "b_in": u(keys[8], (1, hidden_size), k_gru),
        "b_hr": u(keys[9], (1, hidden_size), k_gru),
        "b_hz": u(keys[10], (1, hidden_size), k_gru),
        "b_hn": u(keys[11], (1, hidden_size), k_gru),
        # fc: stored as (H, O) == W_fc^T, bias (1, O)
        "w_fc": u(keys[12], (hidden_size, output_size), k_fc),
        "b_fc": u(keys[13], (1, output_size), k_fc),
    }


def _reference_forward(x, p):
    """Pure-JAX f32 reference of the PyTorch GRUModel forward (sanity check)."""
    B, T, _ = x.shape
    H = p["w_hr"].shape[0]
    h = jnp.zeros((B, H), jnp.float32)
    for t in range(T):
        x_t = x[:, t, :]
        r = jax.nn.sigmoid(x_t @ p["w_ir"] + p["b_ir"] + h @ p["w_hr"] + p["b_hr"])
        z = jax.nn.sigmoid(x_t @ p["w_iz"] + p["b_iz"] + h @ p["w_hz"] + p["b_hz"])
        n = jnp.tanh(x_t @ p["w_in"] + p["b_in"] + r * (h @ p["w_hn"] + p["b_hn"]))
        h = (1.0 - z) * n + z * h
    return h @ p["w_fc"] + p["b_fc"]


if __name__ == "__main__":
    batch, seq, input_size, hidden_size, output_size = 2, 8, 16, 32, 8

    key = jax.random.PRNGKey(0)
    k_x, k_p = jax.random.split(key)
    x = jax.random.normal(k_x, (batch, seq, input_size), jnp.float32)
    params = init_params(k_p, input_size, hidden_size, output_size)

    # One-time weight packing (padding / gate fusion / bf16 cast) outside the
    # per-call jitted forward.
    packed = pack_params(params)

    # time_chunk=4 -> grid of 2 chunks, exercising the pipelined h-carry path.
    out = gru_model_forward(x, packed, output_size=output_size, time_chunk=4)
    out = jax.block_until_ready(out)

    ref = _reference_forward(x, params)
    assert out.shape == (batch, output_size)
    # bf16 MXU operands (f32 accumulate, f32 gate math) => slightly looser
    # tolerance than the pure-f32 variant.
    assert jnp.allclose(out, ref, atol=3e-2, rtol=3e-2), "mismatch vs reference"

    print("KERNEL_OK")
</pallas_src>

<mosaic_0001>
module attributes {stable_mosaic.version = 11 : i64} {
  func.func @_gru_kernel(%arg0: i32, %arg1: memref<4x8x16xbf16, #tpu.memory_space<vmem>>, %arg2: memref<16x384xbf16, #tpu.memory_space<vmem>>, %arg3: memref<1x384xf32, #tpu.memory_space<vmem>>, %arg4: memref<128x384xbf16, #tpu.memory_space<vmem>>, %arg5: memref<1x128xf32, #tpu.memory_space<vmem>>, %arg6: memref<128x128xbf16, #tpu.memory_space<vmem>>, %arg7: memref<1x128xf32, #tpu.memory_space<vmem>>, %arg8: memref<8x128xf32, #tpu.memory_space<vmem>>, %arg9: memref<8x128xf32, #tpu.memory_space<vmem>>, %arg10: memref<4x8x384xf32, #tpu.memory_space<vmem>>) attributes {dimension_semantics = [#tpu.dimension_semantics<arbitrary>], iteration_bounds = array<i64: 2>, scalar_prefetch = 0 : i64, scratch_operands = 2 : i64, tpu.core_type = #tpu.core_type<tc>, window_params = [{transform_indices = @transform_0, window_bounds = array<i64: 4, 8, 16>}, {pipeline_mode = #tpu.pipeline_mode<synchronous>, transform_indices = @transform_1, window_bounds = array<i64: 16, 384>}, {pipeline_mode = #tpu.pipeline_mode<synchronous>, transform_indices = @transform_2, window_bounds = array<i64: 1, 384>}, {pipeline_mode = #tpu.pipeline_mode<synchronous>, transform_indices = @transform_3, window_bounds = array<i64: 128, 384>}, {pipeline_mode = #tpu.pipeline_mode<synchronous>, transform_indices = @transform_4, window_bounds = array<i64: 1, 128>}, {pipeline_mode = #tpu.pipeline_mode<synchronous>, transform_indices = @transform_5, window_bounds = array<i64: 128, 128>}, {pipeline_mode = #tpu.pipeline_mode<synchronous>, transform_indices = @transform_6, window_bounds = array<i64: 1, 128>}, {pipeline_mode = #tpu.pipeline_mode<synchronous>, transform_indices = @transform_7, window_bounds = array<i64: 8, 128>}]} {
    %c0_i32 = arith.constant 0 : i32
    %0 = arith.cmpi eq, %arg0, %c0_i32 : i32
    %1 = arith.extui %0 : i1 to i32
    %c0_i32_0 = arith.constant 0 : i32
    %2 = arith.cmpi ne, %1, %c0_i32_0 : i32
    scf.if %2 {
      %cst_45 = arith.constant 0.000000e+00 : f32
      %149 = vector.broadcast %cst_45 : f32 to vector<8x128xf32>
      %c0_46 = arith.constant 0 : index
      %c0_47 = arith.constant 0 : index
      %150 = vector.load %arg9[%c0_46, %c0_47] : memref<8x128xf32, #tpu.memory_space<vmem>>, vector<8x128xf32>
      tpu.vector_store %arg9[%c0_46, %c0_47], %149 {strides = array<i32>} : memref<8x128xf32, #tpu.memory_space<vmem>>, vector<8x128xf32>,
    } else {
    }
    %c0 = arith.constant 0 : index
    %c0_1 = arith.constant 0 : index
    %c0_2 = arith.constant 0 : index
    %3 = vector.load %arg1[%c0, %c0_1, %c0_2] : memref<4x8x16xbf16, #tpu.memory_space<vmem>>, vector<4x8x16xbf16>
    %4 = vector.shape_cast %3 : vector<4x8x16xbf16> to vector<32x16xbf16>
    %c0_3 = arith.constant 0 : index
    %c0_4 = arith.constant 0 : index
    %5 = vector.load %arg2[%c0_3, %c0_4] : memref<16x384xbf16, #tpu.memory_space<vmem>>, vector<16x384xbf16>
    %cst = arith.constant dense<0.000000e+00> : vector<32x384xf32>
    %6 = tpu.matmul %4, %5, %cst {dimension_numbers = #tpu.dot_dimension_numbers<[1], [0], [0], [1], [0, 0, 1, 1], [], []>} : vector<32x16xbf16>, vector<16x384xbf16>, vector<32x384xf32> -> vector<32x384xf32>
    %c0_5 = arith.constant 0 : index
    %c0_6 = arith.constant 0 : index
    %7 = vector.load %arg3[%c0_5, %c0_6] : memref<1x384xf32, #tpu.memory_space<vmem>>, vector<1x384xf32>
    %8 = vector.broadcast %7 : vector<1x384xf32> to vector<32x384xf32>
    %9 = arith.addf %6, %8 : vector<32x384xf32>
    %10 = vector.shape_cast %9 : vector<32x384xf32> to vector<4x8x384xf32>
    %c0_7 = arith.constant 0 : index
    %c0_8 = arith.constant 0 : index
    %c0_9 = arith.constant 0 : index
    %11 = vector.load %arg10[%c0_7, %c0_8, %c0_9] : memref<4x8x384xf32, #tpu.memory_space<vmem>>, vector<4x8x384xf32>
    tpu.vector_store %arg10[%c0_7, %c0_8, %c0_9], %10 {strides = array<i32>} : memref<4x8x384xf32, #tpu.memory_space<vmem>>, vector<4x8x384xf32>,
    %c0_10 = arith.constant 0 : index
    %c0_11 = arith.constant 0 : index
    %12 = vector.load %arg4[%c0_10, %c0_11] : memref<128x384xbf16, #tpu.memory_space<vmem>>, vector<128x384xbf16>
    %c0_12 = arith.constant 0 : index
    %c0_13 = arith.constant 0 : index
    %13 = vector.load %arg5[%c0_12, %c0_13] : memref<1x128xf32, #tpu.memory_space<vmem>>, vector<1x128xf32>
    %14 = vector.shape_cast %13 : vector<1x128xf32> to vector<1x128xf32>
    %15 = vector.broadcast %14 : vector<1x128xf32> to vector<8x128xf32>
    %c0_14 = arith.constant 0 : index
    %c0_15 = arith.constant 0 : index
    %16 = vector.load %arg9[%c0_14, %c0_15] : memref<8x128xf32, #tpu.memory_space<vmem>>, vector<8x128xf32>
    %c0_i32_16 = arith.constant 0 : i32
    %17 = arith.index_cast %c0_i32_16 : i32 to index
    %c0_17 = arith.constant 0 : index
    %c0_18 = arith.constant 0 : index
    %18 = vector.load %arg10[%17, %c0_17, %c0_18] : memref<4x8x384xf32, #tpu.memory_space<vmem>>, vector<1x8x384xf32>
    %19 = vector.shape_cast %18 : vector<1x8x384xf32> to vector<8x384xf32>
    %20 = arith.truncf %16 : vector<8x128xf32> to vector<8x128xbf16>
    %cst_19 = arith.constant dense<0.000000e+00> : vector<8x384xf32>
    %21 = tpu.matmul %20, %12, %cst_19 {dimension_numbers = #tpu.dot_dimension_numbers<[1], [0], [0], [1], [0, 0, 1, 1], [], []>} : vector<8x128xbf16>, vector<128x384xbf16>, vector<8x384xf32> -> vector<8x384xf32>
    %22 = vector.extract_strided_slice %19 {offsets = [0, 0], sizes = [8, 128], strides = [1, 1]} : vector<8x384xf32> to vector<8x128xf32>
    %23 = vector.extract_strided_slice %21 {offsets = [0, 0], sizes = [8, 128], strides = [1, 1]} : vector<8x384xf32> to vector<8x128xf32>
    %24 = arith.addf %22, %23 : vector<8x128xf32>
    %25 = arith.negf %24 : vector<8x128xf32>
    %26 = math.exp %25 : vector<8x128xf32>
    %cst_20 = arith.constant 1.000000e+00 : f32
    %27 = vector.broadcast %cst_20 : f32 to vector<8x128xf32>
    %28 = arith.addf %27, %26 : vector<8x128xf32>
    %29 = arith.divf %27, %28 : vector<8x128xf32>
    %30 = vector.extract_strided_slice %19 {offsets = [0, 128], sizes = [8, 128], strides = [1, 1]} : vector<8x384xf32> to vector<8x128xf32>
    %31 = vector.extract_strided_slice %21 {offsets = [0, 128], sizes = [8, 128], strides = [1, 1]} : vector<8x384xf32> to vector<8x128xf32>
    %32 = arith.addf %30, %31 : vector<8x128xf32>
    %33 = arith.negf %32 : vector<8x128xf32>
    %34 = math.exp %33 : vector<8x128xf32>
    %cst_21 = arith.constant 1.000000e+00 : f32
    %35 = vector.broadcast %cst_21 : f32 to vector<8x128xf32>
    %36 = arith.addf %35, %34 : vector<8x128xf32>
    %37 = arith.divf %35, %36 : vector<8x128xf32>
    %38 = vector.extract_strided_slice %19 {offsets = [0, 256], sizes = [8, 128], strides = [1, 1]} : vector<8x384xf32> to vector<8x128xf32>
    %39 = vector.extract_strided_slice %21 {offsets = [0, 256], sizes = [8, 128], strides = [1, 1]} : vector<8x384xf32> to vector<8x128xf32>
    %40 = arith.addf %39, %15 : vector<8x128xf32>
    %41 = arith.mulf %29, %40 : vector<8x128xf32>
    %42 = arith.addf %38, %41 : vector<8x128xf32>
    %43 = math.tanh %42 : vector<8x128xf32>
    %cst_22 = arith.constant 1.000000e+00 : f32
    %44 = vector.broadcast %cst_22 : f32 to vector<8x128xf32>
    %45 = arith.subf %44, %37 : vector<8x128xf32>
    %46 = arith.mulf %45, %43 : vector<8x128xf32>
    %47 = arith.mulf %37, %16 : vector<8x128xf32>
    %48 = arith.addf %46, %47 : vector<8x128xf32>
    %c1_i32 = arith.constant 1 : i32
    %49 = arith.index_cast %c1_i32 : i32 to index
    %c0_23 = arith.constant 0 : index
    %c0_24 = arith.constant 0 : index
    %50 = vector.load %arg10[%49, %c0_23, %c0_24] : memref<4x8x384xf32, #tpu.memory_space<vmem>>, vector<1x8x384xf32>
    %51 = vector.shape_cast %50 : vector<1x8x384xf32> to vector<8x384xf32>
    %52 = arith.truncf %48 : vector<8x128xf32> to vector<8x128xbf16>
    %cst_25 = arith.constant dense<0.000000e+00> : vector<8x384xf32>
    %53 = tpu.matmul %52, %12, %cst_25 {dimension_numbers = #tpu.dot_dimension_numbers<[1], [0], [0], [1], [0, 0, 1, 1], [], []>} : vector<8x128xbf16>, vector<128x384xbf16>, vector<8x384xf32> -> vector<8x384xf32>
    %54 = vector.extract_strided_slice %51 {offsets = [0, 0], sizes = [8, 128], strides = [1, 1]} : vector<8x384xf32> to vector<8x128xf32>
    %55 = vector.extract_strided_slice %53 {offsets = [0, 0], sizes = [8, 128], strides = [1, 1]} : vector<8x384xf32> to vector<8x128xf32>
    %56 = arith.addf %54, %55 : vector<8x128xf32>
    %57 = arith.negf %56 : vector<8x128xf32>
    %58 = math.exp %57 : vector<8x128xf32>
    %cst_26 = arith.constant 1.000000e+00 : f32
    %59 = vector.broadcast %cst_26 : f32 to vector<8x128xf32>
    %60 = arith.addf %59, %58 : vector<8x128xf32>
    %61 = arith.divf %59, %60 : vector<8x128xf32>
    %62 = vector.extract_strided_slice %51 {offsets = [0, 128], sizes = [8, 128], strides = [1, 1]} : vector<8x384xf32> to vector<8x128xf32>
    %63 = vector.extract_strided_slice %53 {offsets = [0, 128], sizes = [8, 128], strides = [1, 1]} : vector<8x384xf32> to vector<8x128xf32>
    %64 = arith.addf %62, %63 : vector<8x128xf32>
    %65 = arith.negf %64 : vector<8x128xf32>
    %66 = math.exp %65 : vector<8x128xf32>
    %cst_27 = arith.constant 1.000000e+00 : f32
    %67 = vector.broadcast %cst_27 : f32 to vector<8x128xf32>
    %68 = arith.addf %67, %66 : vector<8x128xf32>
    %69 = arith.divf %67, %68 : vector<8x128xf32>
    %70 = vector.extract_strided_slice %51 {offsets = [0, 256], sizes = [8, 128], strides = [1, 1]} : vector<8x384xf32> to vector<8x128xf32>
    %71 = vector.extract_strided_slice %53 {offsets = [0, 256], sizes = [8, 128], strides = [1, 1]} : vector<8x384xf32> to vector<8x128xf32>
    %72 = arith.addf %71, %15 : vector<8x128xf32>
    %73 = arith.mulf %61, %72 : vector<8x128xf32>
    %74 = arith.addf %70, %73 : vector<8x128xf32>
    %75 = math.tanh %74 : vector<8x128xf32>
    %cst_28 = arith.constant 1.000000e+00 : f32
    %76 = vector.broadcast %cst_28 : f32 to vector<8x128xf32>
    %77 = arith.subf %76, %69 : vector<8x128xf32>
    %78 = arith.mulf %77, %75 : vector<8x128xf32>
    %79 = arith.mulf %69, %48 : vector<8x128xf32>
    %80 = arith.addf %78, %79 : vector<8x128xf32>
    %c2_i32 = arith.constant 2 : i32
    %81 = arith.index_cast %c2_i32 : i32 to index
    %c0_29 = arith.constant 0 : index
    %c0_30 = arith.constant 0 : index
    %82 = vector.load %arg10[%81, %c0_29, %c0_30] : memref<4x8x384xf32, #tpu.memory_space<vmem>>, vector<1x8x384xf32>
    %83 = vector.shape_cast %82 : vector<1x8x384xf32> to vector<8x384xf32>
    %84 = arith.truncf %80 : vector<8x128xf32> to vector<8x128xbf16>
    %cst_31 = arith.constant dense<0.000000e+00> : vector<8x384xf32>
    %85 = tpu.matmul %84, %12, %cst_31 {dimension_numbers = #tpu.dot_dimension_numbers<[1], [0], [0], [1], [0, 0, 1, 1], [], []>} : vector<8x128xbf16>, vector<128x384xbf16>, vector<8x384xf32> -> vector<8x384xf32>
    %86 = vector.extract_strided_slice %83 {offsets = [0, 0], sizes = [8, 128], strides = [1, 1]} : vector<8x384xf32> to vector<8x128xf32>
    %87 = vector.extract_strided_slice %85 {offsets = [0, 0], sizes = [8, 128], strides = [1, 1]} : vector<8x384xf32> to vector<8x128xf32>
    %88 = arith.addf %86, %87 : vector<8x128xf32>
    %89 = arith.negf %88 : vector<8x128xf32>
    %90 = math.exp %89 : vector<8x128xf32>
    %cst_32 = arith.constant 1.000000e+00 : f32
    %91 = vector.broadcast %cst_32 : f32 to vector<8x128xf32>
    %92 = arith.addf %91, %90 : vector<8x128xf32>
    %93 = arith.divf %91, %92 : vector<8x128xf32>
    %94 = vector.extract_strided_slice %83 {offsets = [0, 128], sizes = [8, 128], strides = [1, 1]} : vector<8x384xf32> to vector<8x128xf32>
    %95 = vector.extract_strided_slice %85 {offsets = [0, 128], sizes = [8, 128], strides = [1, 1]} : vector<8x384xf32> to vector<8x128xf32>
    %96 = arith.addf %94, %95 : vector<8x128xf32>
    %97 = arith.negf %96 : vector<8x128xf32>
    %98 = math.exp %97 : vector<8x128xf32>
    %cst_33 = arith.constant 1.000000e+00 : f32
    %99 = vector.broadcast %cst_33 : f32 to vector<8x128xf32>
    %100 = arith.addf %99, %98 : vector<8x128xf32>
    %101 = arith.divf %99, %100 : vector<8x128xf32>
    %102 = vector.extract_strided_slice %83 {offsets = [0, 256], sizes = [8, 128], strides = [1, 1]} : vector<8x384xf32> to vector<8x128xf32>
    %103 = vector.extract_strided_slice %85 {offsets = [0, 256], sizes = [8, 128], strides = [1, 1]} : vector<8x384xf32> to vector<8x128xf32>
    %104 = arith.addf %103, %15 : vector<8x128xf32>
    %105 = arith.mulf %93, %104 : vector<8x128xf32>
    %106 = arith.addf %102, %105 : vector<8x128xf32>
    %107 = math.tanh %106 : vector<8x128xf32>
    %cst_34 = arith.constant 1.000000e+00 : f32
    %108 = vector.broadcast %cst_34 : f32 to vector<8x128xf32>
    %109 = arith.subf %108, %101 : vector<8x128xf32>
    %110 = arith.mulf %109, %107 : vector<8x128xf32>
    %111 = arith.mulf %101, %80 : vector<8x128xf32>
    %112 = arith.addf %110, %111 : vector<8x128xf32>
    %c3_i32 = arith.constant 3 : i32
    %113 = arith.index_cast %c3_i32 : i32 to index
    %c0_35 = arith.constant 0 : index
    %c0_36 = arith.constant 0 : index
    %114 = vector.load %arg10[%113, %c0_35, %c0_36] : memref<4x8x384xf32, #tpu.memory_space<vmem>>, vector<1x8x384xf32>
    %115 = vector.shape_cast %114 : vector<1x8x384xf32> to vector<8x384xf32>
    %116 = arith.truncf %112 : vector<8x128xf32> to vector<8x128xbf16>
    %cst_37 = arith.constant dense<0.000000e+00> : vector<8x384xf32>
    %117 = tpu.matmul %116, %12, %cst_37 {dimension_numbers = #tpu.dot_dimension_numbers<[1], [0], [0], [1], [0, 0, 1, 1], [], []>} : vector<8x128xbf16>, vector<128x384xbf16>, vector<8x384xf32> -> vector<8x384xf32>
    %118 = vector.extract_strided_slice %115 {offsets = [0, 0], sizes = [8, 128], strides = [1, 1]} : vector<8x384xf32> to vector<8x128xf32>
    %119 = vector.extract_strided_slice %117 {offsets = [0, 0], sizes = [8, 128], strides = [1, 1]} : vector<8x384xf32> to vector<8x128xf32>
    %120 = arith.addf %118, %119 : vector<8x128xf32>
    %121 = arith.negf %120 : vector<8x128xf32>
    %122 = math.exp %121 : vector<8x128xf32>
    %cst_38 = arith.constant 1.000000e+00 : f32
    %123 = vector.broadcast %cst_38 : f32 to vector<8x128xf32>
    %124 = arith.addf %123, %122 : vector<8x128xf32>
    %125 = arith.divf %123, %124 : vector<8x128xf32>
    %126 = vector.extract_strided_slice %115 {offsets = [0, 128], sizes = [8, 128], strides = [1, 1]} : vector<8x384xf32> to vector<8x128xf32>
    %127 = vector.extract_strided_slice %117 {offsets = [0, 128], sizes = [8, 128], strides = [1, 1]} : vector<8x384xf32> to vector<8x128xf32>
    %128 = arith.addf %126, %127 : vector<8x128xf32>
    %129 = arith.negf %128 : vector<8x128xf32>
    %130 = math.exp %129 : vector<8x128xf32>
    %cst_39 = arith.constant 1.000000e+00 : f32
    %131 = vector.broadcast %cst_39 : f32 to vector<8x128xf32>
    %132 = arith.addf %131, %130 : vector<8x128xf32>
    %133 = arith.divf %131, %132 : vector<8x128xf32>
    %134 = vector.extract_strided_slice %115 {offsets = [0, 256], sizes = [8, 128], strides = [1, 1]} : vector<8x384xf32> to vector<8x128xf32>
    %135 = vector.extract_strided_slice %117 {offsets = [0, 256], sizes = [8, 128], strides = [1, 1]} : vector<8x384xf32> to vector<8x128xf32>
    %136 = arith.addf %135, %15 : vector<8x128xf32>
    %137 = arith.mulf %125, %136 : vector<8x128xf32>
    %138 = arith.addf %134, %137 : vector<8x128xf32>
    %139 = math.tanh %138 : vector<8x128xf32>
    %cst_40 = arith.constant 1.000000e+00 : f32
    %140 = vector.broadcast %cst_40 : f32 to vector<8x128xf32>
    %141 = arith.subf %140, %133 : vector<8x128xf32>
    %142 = arith.mulf %141, %139 : vector<8x128xf32>
    %143 = arith.mulf %133, %112 : vector<8x128xf32>
    %144 = arith.addf %142, %143 : vector<8x128xf32>
    %c4_i32 = arith.constant 4 : i32
    %c0_41 = arith.constant 0 : index
    %c0_42 = arith.constant 0 : index
    %145 = vector.load %arg9[%c0_41, %c0_42] : memref<8x128xf32, #tpu.memory_space<vmem>>, vector<8x128xf32>
    tpu.vector_store %arg9[%c0_41, %c0_42], %144 {strides = array<i32>} : memref<8x128xf32, #tpu.memory_space<vmem>>, vector<8x128xf32>,
    %c1_i32_43 = arith.constant 1 : i32
    %146 = arith.cmpi eq, %arg0, %c1_i32_43 : i32
    %147 = arith.extui %146 : i1 to i32
    %c0_i32_44 = arith.constant 0 : i32
    %148 = arith.cmpi ne, %147, %c0_i32_44 : i32
    scf.if %148 {
      %c0_45 = arith.constant 0 : index
      %c0_46 = arith.constant 0 : index
      %149 = vector.load %arg9[%c0_45, %c0_46] : memref<8x128xf32, #tpu.memory_space<vmem>>, vector<8x128xf32>
      %150 = arith.truncf %149 : vector<8x128xf32> to vector<8x128xbf16>
      %c0_47 = arith.constant 0 : index
      %c0_48 = arith.constant 0 : index
      %151 = vector.load %arg6[%c0_47, %c0_48] : memref<128x128xbf16, #tpu.memory_space<vmem>>, vector<128x128xbf16>
      %cst_49 = arith.constant dense<0.000000e+00> : vector<8x128xf32>
      %152 = tpu.matmul %150, %151, %cst_49 {dimension_numbers = #tpu.dot_dimension_numbers<[1], [0], [0], [1], [0, 0, 1, 1], [], []>} : vector<8x128xbf16>, vector<128x128xbf16>, vector<8x128xf32> -> vector<8x128xf32>
      %c0_50 = arith.constant 0 : index
      %c0_51 = arith.constant 0 : index
      %153 = vector.load %arg7[%c0_50, %c0_51] : memref<1x128xf32, #tpu.memory_space<vmem>>, vector<1x128xf32>
      %154 = vector.broadcast %153 : vector<1x128xf32> to vector<8x128xf32>
      %155 = arith.addf %152, %154 : vector<8x128xf32>
      %c0_52 = arith.constant 0 : index
      %c0_53 = arith.constant 0 : index
      %156 = vector.load %arg8[%c0_52, %c0_53] : memref<8x128xf32, #tpu.memory_space<vmem>>, vector<8x128xf32>
      tpu.vector_store %arg8[%c0_52, %c0_53], %155 {strides = array<i32>} : memref<8x128xf32, #tpu.memory_space<vmem>>, vector<8x128xf32>,
    } else {
    }
    return
  }
  func.func @transform_0(%arg0: i32) -> (i32, i32, i32) {
    %c0_i32 = arith.constant 0 : i32
    %c0_i32_0 = arith.constant 0 : i32
    %c0_i32_1 = arith.constant 0 : i32
    return %arg0, %c0_i32, %c0_i32_0 : i32, i32, i32
  }
  func.func @transform_1(%arg0: i32) -> (i32, i32) {
    %c0_i32 = arith.constant 0 : i32
    %c0_i32_0 = arith.constant 0 : i32
    %c0_i32_1 = arith.constant 0 : i32
    return %c0_i32, %c0_i32_0 : i32, i32
  }
  func.func @transform_2(%arg0: i32) -> (i32, i32) {
    %c0_i32 = arith.constant 0 : i32
    %c0_i32_0 = arith.constant 0 : i32
    %c0_i32_1 = arith.constant 0 : i32
    return %c0_i32, %c0_i32_0 : i32, i32
  }
  func.func @transform_3(%arg0: i32) -> (i32, i32) {
    %c0_i32 = arith.constant 0 : i32
    %c0_i32_0 = arith.constant 0 : i32
    %c0_i32_1 = arith.constant 0 : i32
    return %c0_i32, %c0_i32_0 : i32, i32
  }
  func.func @transform_4(%arg0: i32) -> (i32, i32) {
    %c0_i32 = arith.constant 0 : i32
    %c0_i32_0 = arith.constant 0 : i32
    %c0_i32_1 = arith.constant 0 : i32
    return %c0_i32, %c0_i32_0 : i32, i32
  }
  func.func @transform_5(%arg0: i32) -> (i32, i32) {
    %c0_i32 = arith.constant 0 : i32
    %c0_i32_0 = arith.constant 0 : i32
    %c0_i32_1 = arith.constant 0 : i32
    return %c0_i32, %c0_i32_0 : i32, i32
  }
  func.func @transform_6(%arg0: i32) -> (i32, i32) {
    %c0_i32 = arith.constant 0 : i32
    %c0_i32_0 = arith.constant 0 : i32
    %c0_i32_1 = arith.constant 0 : i32
    return %c0_i32, %c0_i32_0 : i32, i32
  }
  func.func @transform_7(%arg0: i32) -> (i32, i32) {
    %c0_i32 = arith.constant 0 : i32
    %c0_i32_0 = arith.constant 0 : i32
    %c0_i32_1 = arith.constant 0 : i32
    return %c0_i32, %c0_i32_0 : i32, i32
  }
}

</mosaic_0001>

<bundles_post_ra>
// kernel: gru_model_forward.1
= control target key start
LH: loop header
LB: loop body
LE: loop exit
PB: predicated region body
PF: predicated region fallthrough
CT: control target
= control target key end

     0   :  { %12 = vsyncpa [#allocation5], 0  ;;  %s2077_s0 = inlined_call_operand.vmem [shape: bf16[8,8,16], index: 0, kind: input, shape index: {}]   ;;  %s2078_s1 = inlined_call_operand.hbm [shape: bf16[16,384], index: 1, kind: input, shape index: {}]   ;;  %s2079_s2 = inlined_call_operand.vmem [shape: f32[1,384], index: 2, kind: input, shape index: {}]   ;;  %s2080_s3 = inlined_call_operand.hbm [shape: bf16[128,384], index: 3, kind: input, shape index: {}]   ;;  %s2081_s4 = inlined_call_operand.vmem [shape: f32[1,128], index: 4, kind: input, shape index: {}]   ;;  %s2082_s5 = inlined_call_operand.vmem [shape: bf16[128,128], index: 5, kind: input, shape index: {}]   ;;  %s2083_s6 = inlined_call_operand.vmem [shape: f32[1,128], index: 6, kind: input, shape index: {}]   ;;  %s2084_s7 = inlined_call_operand.vmem [shape: f32[8,128], index: 7, kind: output, shape index: {}]  }
   0x1   :  { %13 = vsyncpa [#allocation7], 0  ;;  %s1706_s24 = smov 0  }
   0x2 LB: > { %s1712_s25 = sadd.s32 4294967295, %s1654_s24   ;;  %p1243_p0 = scmp.ge.s32.totalorder %s1654_s24, 1  ;;  %s1654_s24 = sphi %s1706_s24, %s19_s24  }
   0x3   : > { %p197_p1 = scmp.lt.s32.totalorder %s1654_s24, 3  ;;  %s1656_s26 = smov [#allocation4]  }
   0x4   : > { %s209_s27 = sshll.u32 %s1656_s26, 4  ;;  %p2085_p4 = scmp.eq.s32.totalorder %s1712_s25, 0  ;;  %s210_s27 = int_to_ptr.vmem [resolvable:$true] %s209_s27 }
   0x5   : > { %p1717_p3 = pnand %p1243_p0, %p197_p1  ;;  %s1657_s29 = smov [#allocation6]  }
   0x6   : > { %s225_s30 = sshll.u32 %s1657_s29, 4  ;;  %s1584_s11 = scalar_lea.hbm %s2078_s1, 384  ;;  %s1730_s30 = int_to_ptr.vmem [resolvable:$true] %s225_s30 }
   0x7   : > { %s2087_s28 = scalar_select %p1717_p3, 1, 0 }
   0x8   : > { %p1469_p5 = pneg %p1717_p3  ;;  %p1585_p7 = scmp.ne.s32.totalorder %s2078_s1, %s1584_s11 }
   0x9   : > { %p1591_p11 = scmp.lt.u32.totalorder %s1584_s11, %s2078_s1 }
   0xa   : > { %p1726_p6 = pnand %p2085_p4, %p1469_p5 }
   0xc   : > { %p1586_p8 = pneg %p1726_p6 }
   0xe   : > { %p1587_p9 = pnand %p1586_p8, %p1585_p7 }
  0x10   : > { %p1588_p10 = pneg %p1587_p9 }
  0x12   : > { %p1593_p12 = pnand %p1591_p11, %p1588_p10 }
  0x14   : > { %1596 = shalt.err (!%p1593_p12)
}
  0x15   : > { %s1597_s16 = scalar_lea.vmem %s210_s27, 384  ;;  %p1605_p5 = scmp.lt.s32.totalorder %s210_s27, %s210_s27 }
  0x16   : > { %p1598_p13 = scmp.ne.s32.totalorder %s210_s27, %s1597_s16  ;;  %p1606_p2 = scmp.lt.s32.totalorder %s1597_s16, %s1597_s16 }
  0x18   : > { %p1600_p0 = pnand %p1598_p13, %p1586_p8  ;;  %p1607_p4 = por %p1606_p2, %p1605_p5 }
  0x1a   : > { %p1601_p1 = pneg %p1600_p0 }
  0x1c   : > { %p1608_p3 = pnand %p1607_p4, %p1601_p1 }
  0x1e   : > { %1611 = shalt.err (!%p1608_p3)
}
  0x1f   : > { %s1658_s17 = smov 192   ;;  %s1659_s18 = smov 12  }
  0x20   : > { %1472 = dma.hbm_to_vmem [thread:$0]  (!%p1726_p6), %s2078_s1, 384, %s210_s27, [#allocation5], %s1658_s17, %s1658_s17, %s1659_s18  }
  0x21   : > { %s1612_s23 = scalar_lea.hbm %s2080_s3, 3072 }
  0x22   : > { %p1613_p7 = scmp.ne.s32.totalorder %s2080_s3, %s1612_s23  ;;  %p1619_p4 = scmp.lt.u32.totalorder %s1612_s23, %s2080_s3 }
  0x24   : > { %p1615_p2 = pnand %p1613_p7, %p1586_p8 }
  0x26   : > { %p1616_p3 = pneg %p1615_p2 }
  0x28   : > { %p1621_p9 = pnand %p1619_p4, %p1616_p3 }
  0x2a   : > { %1624 = shalt.err (!%p1621_p9)
}
  0x2b   : > { %s1625_s27 = scalar_lea.vmem %s1730_s30, 3072  ;;  %p1633_p13 = scmp.lt.s32.totalorder %s1730_s30, %s1730_s30 }
  0x2c   : > { %p1626_p10 = scmp.ne.s32.totalorder %s1730_s30, %s1625_s27  ;;  %p1634_p0 = scmp.lt.s32.totalorder %s1625_s27, %s1625_s27 }
  0x2e   : > { %p1628_p11 = pnand %p1626_p10, %p1586_p8  ;;  %p1635_p1 = por %p1634_p0, %p1633_p13 }
  0x30   : > { %p1629_p12 = pneg %p1628_p11 }
  0x32   : > { %p1636_p5 = pnand %p1635_p1, %p1629_p12 }
  0x34   : > { %1639 = shalt.err (!%p1636_p5)
}
  0x35   : > { %1475 = dma.hbm_to_vmem [thread:$0]  (!%p1726_p6), %s2080_s3, 3072, %s1730_s30, [#allocation7], %s1658_s17, %s1658_s17, %s1659_s18  }
  0x36   : > { %p2089_p7 = scmp.ne.s32.totalorder %s2087_s28, 0 }
  0x37   : > { %p2090_p2 = scmp.eq.s32.totalorder (!%p2089_p7), %s1712_s25, 0 }
  0x38   : > { %259 = sbr.rel (%p2089_p7) target bundleno = 1381 (0x565), region = 48 }
  0x3f   : > { %1645 = dma.done.wait (%p2090_p2), [#allocation5], 384   ;;  %p2091_p8 = pmov %p2090_p2 }
  0x40   : > { %p2092_p3 = pmov %p2090_p2 }
  0x41   : > { %1647 = vsyncadd (%p2091_p8), [#allocation5], 4294966912 }
  0x42   : > { %1649 = dma.done.wait (%p2092_p3), [#allocation7], 3072   ;;  %p2093_p4 = pmov %p2090_p2 }
  0x43   : > { %s1250_s8 = sshll.u32 %s1712_s25, 2  ;;  %p2094_p6 = scmp.ne.s32.totalorder %s1712_s25, 0 }
  0x44   : > { %1651 = vsyncadd (%p2093_p4), [#allocation7], 4294964224  ;;  %p291_p9 = scmp.lt.s32.totalorder %s1250_s8, 7  ;;  %v1660_v0 = vmov (!%p2094_p6), 0.0  }
  0x45   : > { %300 = sbr.rel (%p2094_p6) target bundleno = 76 (0x4c), region = 60  ;;  %301 = vst [vmem:[#allocation2] sm:$0xff] (!%p2094_p6), %v1660_v0 }
  0x46   : > { %s2096_s8 = smov (!%p291_p9, %s1250_s8), 7 }
  0x47   : > { %s1251_s30 = sshll.u32 %s2096_s8, 2 }
  0x48   : > { %s294_s14 = scalar_lea.vmem %s2077_s0, %s1251_s30 }
  0x4c PF: > { %v1498_v1 = vld [vmem:[#allocation4 + $0x4] ss:$12 sps:$4 sm:$0xff]   ;;  %v1500_v2 = vld [vmem:[#allocation4] ss:$12 sps:$4 sm:$0xff]   ;;  %v1661_v3 = vmov 0   ;;  %v1501_v4 = vld [vmem:[%s294_s14] sm:$0xff]   ;;  %v312_v34 = vlaneseq }
  0x4d   : > { %392 = vmatprep.mubr.bf16.mxu0 %v1661_v3  ;;  %360 = vmatprep.subr.bf16.mxu0 %v1498_v1  ;;  %vm353_vm0 = vcmask 130048   ;;  %v1796_v5 = vld [vmem:[#allocation6 + $0x4] ss:$12 sps:$4 sm:$0xff]   ;;  %v1798_v6 = vld [vmem:[#allocation6] ss:$12 sps:$4 sm:$0xff]   ;;  %v1662_v14 = vmov 0.0  }
  0x4e   : > { %361 = vmatpush1.bf16.msra.mxu0 %v1500_v2  ;;  %v1800_v7 = vld [vmem:[#allocation6 + $0x1c] ss:$12 sps:$4 sm:$0xff]   ;;  %1357 = vmatprep.mubr.msk.bf16.mxu1 %vm353_vm0, %v1501_v4  ;;  %v1806_v8 = vld [vmem:[#allocation6 + $0x18] ss:$12 sps:$4 sm:$0xff]   ;;  %v1810_v9 = vld [vmem:[#allocation6 + $0x34] ss:$12 sps:$4 sm:$0xff]  }
  0x4f   : > { %646 = vmatprep.subr.bf16.mxu0 %v1796_v5  ;;  %v1517_v10 = vld [vmem:[#allocation4 + $0x8] ss:$12 sps:$4 sm:$0xff]   ;;  %v1520_v12 = vld [vmem:[%s294_s14 + $0x8] sm:$0xff]   ;;  %vm1663_vm1 = vmmov 0   ;;  %v1843_v21 = vld [vmem:[#allocation6 + $0x38] ss:$12 sps:$4 sm:$0xff]  }
  0x50   : > { %v1812_v11 = vld [vmem:[#allocation6 + $0x30] ss:$12 sps:$4 sm:$0xff]   ;;  %1355 = vmatprep.subr.bf16.mxu1 %v1517_v10  ;;  %v1816_v13 = vld [vmem:[#allocation6 + $0x4c] ss:$12 sps:$4 sm:$0xff]   ;;  %v1820_v15 = vld [vmem:[#allocation6 + $0x8] ss:$12 sps:$4 sm:$0xff]  }
  0x51   : > { %1258 = vmatmul.mubr.msk.bf16.vlgmr.msra.gmra.mrb[0].mxu0 %vm353_vm0, %v1501_v4  ;;  %1356 = vmatpush3.bf16.msra.mxu1 %v1517_v10  ;;  %v1823_v16 = vld [vmem:[#allocation6 + $0x48] ss:$12 sps:$4 sm:$0xff]   ;;  %v1827_v17 = vld [vmem:[#allocation6 + $0x64] ss:$12 sps:$4 sm:$0xff]   ;;  %v1830_v18 = vld [vmem:[#allocation6 + $0x20] ss:$12 sps:$4 sm:$0xff]  }
  0x52   : > { %647 = vmatpush1.bf16.msra.mxu0 %v1798_v6  ;;  %402 = vmatprep.mubr.bf16.mxu0 %v1661_v3  ;;  %v1834_v19 = vld [vmem:[#allocation6 + $0x60] ss:$12 sps:$4 sm:$0xff]   ;;  %v1839_v20 = vld [vmem:[#allocation6 + $0x7c] ss:$12 sps:$4 sm:$0xff]   ;;  %v1847_v22 = vld [vmem:[#allocation6 + $0x78] ss:$12 sps:$4 sm:$0xff]  }
  0x53   : > { %648 = vmatprep.subr.bf16.mxu0 %v1800_v7  ;;  %1361 = vmatprep.subr.bf16.mxu1 %v1662_v14  ;;  %v1850_v23 = vld [vmem:[#allocation6 + $0x94] ss:$12 sps:$4 sm:$0xff]   ;;  %v1853_v24 = vld [vmem:[#allocation6 + $0x50] ss:$12 sps:$4 sm:$0xff]   ;;  %v1860_v26 = vld [vmem:[#allocation6 + $0xac] ss:$12 sps:$4 sm:$0xff]  }
  0x54   : > { %1358 = vmatmul.mubr.msk.bf16.vlgmr.msra.gmra.mrb[0].mxu1 %vm353_vm0, %v1520_v12  ;;  %v1857_v25 = vld [vmem:[#allocation6 + $0x90] ss:$12 sps:$4 sm:$0xff]   ;;  %v1863_v27 = vld [vmem:[#allocation6 + $0x68] ss:$12 sps:$4 sm:$0xff]   ;;  %v1869_v29 = vld [vmem:[#allocation2] sm:$0xff]  ;;  %v313_v35 = vshrl.u32 %v312_v34, 7 }
  0x55   : > { %1362 = vmatpush3.bf16.msra.mxu1 %v1820_v15  ;;  %1377 = vmatprep.mubr.msk.bf16.mxu1 %vm1663_vm1, %v1662_v14  ;;  %v1867_v28 = vld [vmem:[#allocation6 + $0xa8] ss:$12 sps:$4 sm:$0xff]   ;;  %v1873_v30 = vld [vmem:[#allocation6 + $0x80] ss:$12 sps:$4 sm:$0xff]   ;;  %v517_v31 = vpack.c.bf16 %v1869_v29, %v1869_v29  ;;  %v1880_v32 = vld [vmem:[#allocation6 + $0x98] ss:$12 sps:$4 sm:$0xff]  }
  0x56   : > { %649 = vmatpush1.bf16.msra.mxu0 %v1806_v8  ;;  %1363 = vmatprep.subr.bf16.mxu1 %v1662_v14  ;;  %v1887_v33 = vld [vmem:[#allocation6 + $0xb0] ss:$12 sps:$4 sm:$0xff]   ;;  %v314_v36 = vsub.s32 0, %v313_v35  ;;  %v310_v37 = vld [vmem:[%s2079_s2] sm:$0x7]  ;;  %v318_v38 = vsub.s32 1, %v313_v35 }
  0x57   : > { %650 = vmatprep.subr.bf16.mxu0 %v1810_v9  ;;  %v322_v44 = vsub.s32 2, %v313_v35  ;;  %p1295_p10 = scmp.ne.s32.totalorder %s1712_s25, 1 }
  0x58   : > { %v315_v39 = vrot.slane %v310_v37, %v314_v36  ;;  %v319_v42 = vrot.slane %v310_v37, %v318_v38  ;;  %vm1665_vm2 = vmmov (!%p1295_p10), 0  }
  0x59   : > { %1259 = vmatmul.mubr.msk.bf16.gmra.mrb[4].mxu0 %vm353_vm0, %v1520_v12  ;;  %1364 = vmatpush3.bf16.msra.mxu1 %v1830_v18  ;;  %v323_v48 = vrot.slane %v310_v37, %v322_v44 }
  0x5a   : > { %651 = vmatpush1.bf16.msra.mxu0 %v1812_v11  ;;  %678 = vmatprep.mubr.bf16.mxu0 %v1661_v3 }
  0x5b   : > { %652 = vmatprep.subr.bf16.mxu0 %v1816_v13  ;;  %1365 = vmatprep.subr.bf16.mxu1 %v1662_v14 }
  0x5d   : > { %1366 = vmatpush3.bf16.msra.mxu1 %v1843_v21 }
  0x5e   : > { %653 = vmatpush1.bf16.msra.mxu0 %v1823_v16  ;;  %1367 = vmatprep.subr.bf16.mxu1 %v1662_v14 }
  0x5f   : > { %654 = vmatprep.subr.bf16.mxu0 %v1827_v17 }
  0x61   : > { %1368 = vmatpush3.bf16.msra.mxu1 %v1853_v24 }
  0x62   : > { %655 = vmatpush1.bf16.msra.mxu0 %v1834_v19  ;;  %1369 = vmatprep.subr.bf16.mxu1 %v1662_v14 }
  0x63   : > { %656 = vmatprep.subr.bf16.mxu0 %v1839_v20 }
  0x65   : > { %1370 = vmatpush3.bf16.msra.mxu1 %v1863_v27 }
  0x66   : > { %657 = vmatpush1.bf16.msra.mxu0 %v1847_v22  ;;  %1371 = vmatprep.subr.bf16.mxu1 %v1662_v14 }
  0x67   : > { %658 = vmatprep.subr.bf16.mxu0 %v1850_v23 }
  0x69   : > { %1372 = vmatpush3.bf16.msra.mxu1 %v1873_v30 }
  0x6a   : > { %659 = vmatpush1.bf16.msra.mxu0 %v1857_v25  ;;  %1373 = vmatprep.subr.bf16.mxu1 %v1662_v14 }
  0x6b   : > { %660 = vmatprep.subr.bf16.mxu0 %v1860_v26 }
  0x6d   : > { %1374 = vmatpush3.bf16.msra.mxu1 %v1880_v32 }
  0x6e   : > { %661 = vmatpush1.bf16.msra.mxu0 %v1867_v28  ;;  %1375 = vmatprep.subr.bf16.mxu1 %v1662_v14 }
  0x6f   : > { %754 = vmatprep.subr.bf16.mxu0 %v1796_v5 }
  0x71   : > { %679 = vmatmul.mubr.bf16.vlgmr.msra.gmra.mrb[8].mxu0 %v517_v31  ;;  %1376 = vmatpush3.bf16.msra.mxu1 %v1887_v33 }
  0x72   : > { %755 = vmatpush1.bf16.msra.mxu0 %v1798_v6  ;;  %786 = vmatprep.mubr.bf16.mxu0 %v1661_v3 }
  0x73   : > { %756 = vmatprep.subr.bf16.mxu0 %v1800_v7  ;;  %1381 = vmatprep.subr.bf16.mxu1 %v1662_v14 }
  0x74   : > { %1378 = vmatmul.mubr.bf16.vlgmr.msra.gmra.mrb[4].mxu1 %v517_v31 }
  0x75   : > { %1382 = vmatpush3.bf16.msra.mxu1 %v1820_v15  ;;  %1397 = vmatprep.mubr.msk.bf16.mxu1 %vm1663_vm1, %v1662_v14 }
  0x76   : > { %757 = vmatpush1.bf16.msra.mxu0 %v1806_v8  ;;  %1383 = vmatprep.subr.bf16.mxu1 %v1662_v14 }
  0x77   : > { %758 = vmatprep.subr.bf16.mxu0 %v1810_v9 }
  0x79   : > { %1384 = vmatpush3.bf16.msra.mxu1 %v1830_v18 }
  0x7a   : > { %759 = vmatpush1.bf16.msra.mxu0 %v1812_v11  ;;  %1385 = vmatprep.subr.bf16.mxu1 %v1662_v14 }
  0x7b   : > { %760 = vmatprep.subr.bf16.mxu0 %v1816_v13 }
  0x7d   : > { %1386 = vmatpush3.bf16.msra.mxu1 %v1843_v21 }
  0x7e   : > { %761 = vmatpush1.bf16.msra.mxu0 %v1823_v16  ;;  %1387 = vmatprep.subr.bf16.mxu1 %v1662_v14 }
  0x7f   : > { %762 = vmatprep.subr.bf16.mxu0 %v1827_v17 }
  0x81   : > { %1388 = vmatpush3.bf16.msra.mxu1 %v1853_v24 }
  0x82   : > { %763 = vmatpush1.bf16.msra.mxu0 %v1834_v19  ;;  %1389 = vmatprep.subr.bf16.mxu1 %v1662_v14 }
  0x83   : > { %764 = vmatprep.subr.bf16.mxu0 %v1839_v20 }
  0x85   : > { %1390 = vmatpush3.bf16.msra.mxu1 %v1863_v27 }
  0x86   : > { %765 = vmatpush1.bf16.msra.mxu0 %v1847_v22  ;;  %1391 = vmatprep.subr.bf16.mxu1 %v1662_v14 }
  0x87   : > { %766 = vmatprep.subr.bf16.mxu0 %v1850_v23 }
  0x89   : > { %1392 = vmatpush3.bf16.msra.mxu1 %v1873_v30 }
  0x8a   : > { %767 = vmatpush1.bf16.msra.mxu0 %v1857_v25  ;;  %1393 = vmatprep.subr.bf16.mxu1 %v1662_v14 }
  0x8b   : > { %768 = vmatprep.subr.bf16.mxu0 %v1860_v26 }
  0x8d   : > { %1394 = vmatpush3.bf16.msra.mxu1 %v1880_v32 }
  0x8e   : > { %769 = vmatpush1.bf16.msra.mxu0 %v1867_v28  ;;  %1395 = vmatprep.subr.bf16.mxu1 %v1662_v14 }
  0x8f   : > { %862 = vmatprep.subr.bf16.mxu0 %v1796_v5 }
  0x91   : > { %1396 = vmatpush3.bf16.msra.mxu1 %v1887_v33 }
  0x92   : > { %1401 = vmatprep.subr.bf16.mxu1 %v1662_v14 }
 0x124   : > { %v394_v40 = vpop.f32.mrb[0].mxu0 }
 0x125   : > { %v396_v41 = vpop.f32.mrb[1].mxu0  ;;  %v395_v0 = vadd.f32 %v394_v40, %v315_v39 }
 0x126   : > { %v398_v43 = vpop.f32.mrb[2].mxu0  ;;  %v397_v1 = vadd.f32 %v396_v41, %v319_v42 }
 0x127   : > { %v1928_v45 = vadd.f32 %v398_v43, %v315_v39  ;;  %v400_v46 = vpop.f32.mrb[3].mxu0  ;;  %v1359_v52 = vpop.f32.mrb[0].mxu1 }
 0x128   : > { %v1930_v47 = vadd.f32 %v400_v46, %v319_v42  ;;  %v1936_v55 = vadd.f32 %v1359_v52, %v323_v48  ;;  %v447_v56 = vpop.f32.mrb[1].mxu1 }
 0x129   : > { %v1360_v59 = vpop.f32.mrb[2].mxu1  ;;  %v448_v52 = vadd.f32 %v447_v56, %v323_v48 }
 0x12a   : > { %v1942_v61 = vadd.f32 %v1360_v59, %v323_v48  ;;  %v450_v62 = vpop.f32.mrb[3].mxu1 }
 0x12b   : > { %v1944_v63 = vadd.f32 %v450_v62, %v323_v48 }
 0x12c   : > { %v404_v49 = vpop.f32.mrb[4].mxu0 }
 0x12d   : > { %v1932_v50 = vadd.f32 %v404_v49, %v315_v39  ;;  %v406_v51 = vpop.f32.mrb[5].mxu0 }
 0x12e   : > { %v1934_v53 = vadd.f32 %v406_v51, %v319_v42  ;;  %v408_v54 = vpop.f32.mrb[6].mxu0 }
 0x12f   : > { %v1938_v57 = vadd.f32 %v408_v54, %v315_v39  ;;  %v410_v58 = vpop.f32.mrb[7].mxu0  ;;  %v1949_v39 = vld [vmem:[%s2081_s4] ss:$0 sm:$0xff] }
 0x130   : > { %v1940_v60 = vadd.f32 %v410_v58, %v319_v42 }
 0x144   : > { %v680_v2 = vpop.f32.mrb[8].mxu0 }
 0x145   : > { %v727_v4 = vadd.f32 %v680_v2, %v395_v0  ;;  %v682_v10 = vpop.f32.mrb[9].mxu0 }
 0x146   : > { %v734_v12 = vadd.f32 %v682_v10, %v397_v1  ;;  %v684_v31 = vpop.f32.mrb[10].mxu0 }
 0x147   : > { %v1287_v34 = vmul.f32 -1.442695, %v727_v4  ;;  %v685_v35 = vpop.f32.mrb[11].mxu0  ;;  %v721_v37 = vpop.f32.mrb[4].mxu1 }
 0x148   : > { %v1288_v36 = vmul.f32 -1.442695, %v734_v12  ;;  %v1379_v38 = vpop.f32.mrb[5].mxu1  ;;  %v741_v41 = vadd.f32 %v1949_v39, %v721_v37 }
 0x149   : > { %1536 = vpow2.f32 %v1287_v34  ;;  %v724_v43 = vpop.f32.mrb[6].mxu1 }
 0x14a   : > { %1538 = vpow2.f32 %v1288_v36  ;;  %v1380_v44 = vpop.f32.mrb[7].mxu1 }
 0x153   : > { %v1537_v46 = vpop.eup %1536 }
 0x154   : > { %v731_v49 = vadd.f32 1.0, %v1537_v46  ;;  %v1539_v51 = vpop.eup %1538 }
 0x155   : > { %v738_v40 = vadd.f32 1.0, %v1539_v51 }
 0x156   : > { %1540 = vrcp.f32 %v731_v49 }
 0x157   : > { %1542 = vrcp.f32 %v738_v40 }
 0x160   : > { %v1541_v42 = vpop.eup %1540 }
 0x161   : > { %v742_v54 = vmul.f32 %v1541_v42, %v741_v41  ;;  %v1543_v59 = vpop.eup %1542 }
 0x162   : > { %v745_v62 = vsub.f32 1.0, %v1543_v59  ;;  %v747_v2 = vmul.f32 %v1543_v59, %v1869_v29 }
 0x163   : > { %v743_v58 = vadd.f32 %v742_v54, %v448_v52 }
 0x165   : > { %1544 = vtanh.f32 %v743_v58 }
 0x16f   : > { %v1545_v0 = vpop.eup %1544 }
 0x170   : > { %v746_v1 = vmul.f32 %v1545_v0, %v745_v62 }
 0x172   : > { %v1953_v4 = vadd.f32 %v747_v2, %v746_v1 }
 0x174   : > { %v753_v10 = vpack.c.bf16 %v1953_v4, %v1953_v4 }
 0x176   : > { %787 = vmatmul.mubr.bf16.vlgmr.msra.gmra.mrb[12].mxu0 %v753_v10  ;;  %1398 = vmatmul.mubr.bf16.vlgmr.msra.gmra.mrb[8].mxu1 %v753_v10 }
 0x177   : > { %863 = vmatpush1.bf16.msra.mxu0 %v1798_v6  ;;  %1402 = vmatpush3.bf16.msra.mxu1 %v1820_v15 }
 0x178   : > { %864 = vmatprep.subr.bf16.mxu0 %v1800_v7  ;;  %1403 = vmatprep.subr.bf16.mxu1 %v1662_v14 }
 0x179   : > { %894 = vmatprep.mubr.bf16.mxu0 %v1661_v3  ;;  %1417 = vmatprep.mubr.msk.bf16.mxu1 %vm1663_vm1, %v1662_v14 }
 0x17b   : > { %865 = vmatpush1.bf16.msra.mxu0 %v1806_v8  ;;  %1404 = vmatpush3.bf16.msra.mxu1 %v1830_v18 }
 0x17c   : > { %866 = vmatprep.subr.bf16.mxu0 %v1810_v9  ;;  %1405 = vmatprep.subr.bf16.mxu1 %v1662_v14 }
 0x17f   : > { %867 = vmatpush1.bf16.msra.mxu0 %v1812_v11  ;;  %1406 = vmatpush3.bf16.msra.mxu1 %v1843_v21 }
 0x180   : > { %868 = vmatprep.subr.bf16.mxu0 %v1816_v13  ;;  %1407 = vmatprep.subr.bf16.mxu1 %v1662_v14 }
 0x183   : > { %869 = vmatpush1.bf16.msra.mxu0 %v1823_v16  ;;  %1408 = vmatpush3.bf16.msra.mxu1 %v1853_v24 }
 0x184   : > { %870 = vmatprep.subr.bf16.mxu0 %v1827_v17  ;;  %1409 = vmatprep.subr.bf16.mxu1 %v1662_v14 }
 0x187   : > { %871 = vmatpush1.bf16.msra.mxu0 %v1834_v19  ;;  %1410 = vmatpush3.bf16.msra.mxu1 %v1863_v27 }
 0x188   : > { %872 = vmatprep.subr.bf16.mxu0 %v1839_v20  ;;  %1411 = vmatprep.subr.bf16.mxu1 %v1662_v14 }
 0x18b   : > { %873 = vmatpush1.bf16.msra.mxu0 %v1847_v22  ;;  %1412 = vmatpush3.bf16.msra.mxu1 %v1873_v30 }
 0x18c   : > { %874 = vmatprep.subr.bf16.mxu0 %v1850_v23  ;;  %1413 = vmatprep.subr.bf16.mxu1 %v1662_v14 }
 0x18f   : > { %875 = vmatpush1.bf16.msra.mxu0 %v1857_v25  ;;  %1414 = vmatpush3.bf16.msra.mxu1 %v1880_v32 }
 0x190   : > { %876 = vmatprep.subr.bf16.mxu0 %v1860_v26  ;;  %1415 = vmatprep.subr.bf16.mxu1 %v1662_v14 }
 0x193   : > { %877 = vmatpush1.bf16.msra.mxu0 %v1867_v28  ;;  %1416 = vmatpush3.bf16.msra.mxu1 %v1887_v33 }
 0x194   : > { %970 = vmatprep.subr.bf16.mxu0 %v1796_v5  ;;  %1421 = vmatprep.subr.bf16.mxu1 %v1662_v14 }
 0x249   : > { %v788_v29 = vpop.f32.mrb[12].mxu0  ;;  %v829_v48 = vpop.f32.mrb[8].mxu1 }
 0x24a   : > { %v835_v56 = vadd.f32 %v788_v29, %v1928_v45  ;;  %v790_v12 = vpop.f32.mrb[13].mxu0  ;;  %v1399_v31 = vpop.f32.mrb[9].mxu1  ;;  %v849_v40 = vadd.f32 %v1949_v39, %v829_v48 }
 0x24b   : > { %v842_v34 = vadd.f32 %v790_v12, %v1930_v47  ;;  %v792_v35 = vpop.f32.mrb[14].mxu0  ;;  %v832_v36 = vpop.f32.mrb[10].mxu1 }
 0x24c   : > { %v1289_v37 = vmul.f32 -1.442695, %v835_v56  ;;  %v793_v38 = vpop.f32.mrb[15].mxu0  ;;  %v1400_v43 = vpop.f32.mrb[11].mxu1 }
 0x24d   : > { %v1290_v44 = vmul.f32 -1.442695, %v842_v34 }
 0x24e   : > { %1546 = vpow2.f32 %v1289_v37 }
 0x24f   : > { %1548 = vpow2.f32 %v1290_v44 }
 0x258   : > { %v1547_v46 = vpop.eup %1546 }
 0x259   : > { %v839_v5 = vadd.f32 1.0, %v1547_v46  ;;  %v1549_v49 = vpop.eup %1548 }
 0x25a   : > { %v846_v51 = vadd.f32 1.0, %v1549_v49 }
 0x25b   : > { %1550 = vrcp.f32 %v839_v5 }
 0x25c   : > { %1552 = vrcp.f32 %v846_v51 }
 0x265   : > { %v1551_v45 = vpop.eup %1550 }
 0x266   : > { %v850_v41 = vmul.f32 %v1551_v45, %v849_v40  ;;  %v1553_v42 = vpop.eup %1552 }
 0x267   : > { %v853_v52 = vsub.f32 1.0, %v1553_v42  ;;  %v855_v59 = vmul.f32 %v1553_v42, %v1953_v4  ;;  %v1579_v42 = vld [vmem:[%s2082_s5 + $0x18] sm:$0xff] (!%p1295_p10)  }
 0x268   : > { %v851_v47 = vadd.f32 %v850_v41, %v1944_v63  ;;  %v1664_v41 = vmov (!%p1295_p10), 0.0  }
 0x26a   : > { %1554 = vtanh.f32 %v851_v47  ;;  %v1578_v47 = vld [vmem:[%s2082_s5 + $0x10] sm:$0xff] (!%p1295_p10)  }
 0x274   : > { %v1555_v54 = vpop.eup %1554 }
 0x275   : > { %v854_v58 = vmul.f32 %v1555_v54, %v853_v52  ;;  %v1580_v52 = vld [vmem:[%s2082_s5 + $0x20] sm:$0xff] (!%p1295_p10)   ;;  %v1581_v54 = vld [vmem:[%s2082_s5 + $0x28] sm:$0xff] (!%p1295_p10)  }
 0x277   : > { %v1997_v62 = vadd.f32 %v855_v59, %v854_v58  ;;  %v1582_v58 = vld [vmem:[%s2082_s5 + $0x30] sm:$0xff] (!%p1295_p10)   ;;  %v1583_v59 = vld [vmem:[%s2082_s5 + $0x38] sm:$0xff] (!%p1295_p10)  }
 0x279   : > { %v861_v0 = vpack.c.bf16 %v1997_v62, %v1997_v62 }
 0x27b   : > { %895 = vmatmul.mubr.bf16.vlgmr.msra.gmra.mrb[16].mxu0 %v861_v0  ;;  %1418 = vmatmul.mubr.bf16.vlgmr.msra.gmra.mrb[12].mxu1 %v861_v0 }
 0x27c   : > { %971 = vmatpush1.bf16.msra.mxu0 %v1798_v6  ;;  %1422 = vmatpush3.bf16.msra.mxu1 %v1820_v15 }
 0x27d   : > { %972 = vmatprep.subr.bf16.mxu0 %v1800_v7  ;;  %1423 = vmatprep.subr.bf16.mxu1 %v1662_v14 }
 0x27e   : > { %1002 = vmatprep.mubr.bf16.mxu0 %v1661_v3  ;;  %1437 = vmatprep.mubr.msk.bf16.mxu1 %vm1663_vm1, %v1662_v14 }
 0x280   : > { %973 = vmatpush1.bf16.msra.mxu0 %v1806_v8  ;;  %1424 = vmatpush3.bf16.msra.mxu1 %v1830_v18 }
 0x281   : > { %974 = vmatprep.subr.bf16.mxu0 %v1810_v9  ;;  %1425 = vmatprep.subr.bf16.mxu1 %v1662_v14 }
 0x284   : > { %975 = vmatpush1.bf16.msra.mxu0 %v1812_v11  ;;  %1426 = vmatpush3.bf16.msra.mxu1 %v1843_v21 }
 0x285   : > { %976 = vmatprep.subr.bf16.mxu0 %v1816_v13  ;;  %1427 = vmatprep.subr.bf16.mxu1 %v1662_v14 }
 0x288   : > { %977 = vmatpush1.bf16.msra.mxu0 %v1823_v16  ;;  %1428 = vmatpush3.bf16.msra.mxu1 %v1853_v24 }
 0x289   : > { %978 = vmatprep.subr.bf16.mxu0 %v1827_v17  ;;  %1429 = vmatprep.subr.bf16.mxu1 %v1662_v14 }
 0x28c   : > { %979 = vmatpush1.bf16.msra.mxu0 %v1834_v19  ;;  %1430 = vmatpush3.bf16.msra.mxu1 %v1863_v27 }
 0x28d   : > { %980 = vmatprep.subr.bf16.mxu0 %v1839_v20  ;;  %1431 = vmatprep.subr.bf16.mxu1 %v1662_v14 }
 0x290   : > { %981 = vmatpush1.bf16.msra.mxu0 %v1847_v22  ;;  %1432 = vmatpush3.bf16.msra.mxu1 %v1873_v30 }
 0x291   : > { %982 = vmatprep.subr.bf16.mxu0 %v1850_v23  ;;  %1433 = vmatprep.subr.bf16.mxu1 %v1662_v14 }
 0x294   : > { %983 = vmatpush1.bf16.msra.mxu0 %v1857_v25  ;;  %1434 = vmatpush3.bf16.msra.mxu1 %v1880_v32 }
 0x295   : > { %984 = vmatprep.subr.bf16.mxu0 %v1860_v26  ;;  %1435 = vmatprep.subr.bf16.mxu1 %v1662_v14 }
 0x298   : > { %985 = vmatpush1.bf16.msra.mxu0 %v1867_v28  ;;  %1436 = vmatpush3.bf16.msra.mxu1 %v1887_v33 }
 0x299   : > { %1441 = vmatprep.subr.bf16.mxu0 (!%p1295_p10), %v1664_v41 }
 0x34e   : > { %v896_v3 = vpop.f32.mrb[16].mxu0  ;;  %v937_v6 = vpop.f32.mrb[12].mxu1 }
 0x34f   : > { %v943_v7 = vadd.f32 %v896_v3, %v1932_v50  ;;  %v898_v8 = vpop.f32.mrb[17].mxu0  ;;  %v1419_v9 = vpop.f32.mrb[13].mxu1  ;;  %v957_v23 = vadd.f32 %v1949_v39, %v937_v6  ;;  %v1296_v3 = vld [vmem:[%s2083_s6] ss:$0 sm:$0xff] (!%p1295_p10) }
 0x350   : > { %v950_v11 = vadd.f32 %v898_v8, %v1934_v53  ;;  %v900_v13 = vpop.f32.mrb[18].mxu0  ;;  %v940_v15 = vpop.f32.mrb[14].mxu1 }
 0x351   : > { %v1291_v16 = vmul.f32 -1.442695, %v943_v7  ;;  %v901_v17 = vpop.f32.mrb[19].mxu0  ;;  %v1420_v18 = vpop.f32.mrb[15].mxu1 }
 0x352   : > { %v1292_v19 = vmul.f32 -1.442695, %v950_v11 }
 0x353   : > { %1556 = vpow2.f32 %v1291_v16 }
 0x354   : > { %1558 = vpow2.f32 %v1292_v19 }
 0x35d   : > { %v1557_v14 = vpop.eup %1556 }
 0x35e   : > { %v947_v20 = vadd.f32 1.0, %v1557_v14  ;;  %v1559_v21 = vpop.eup %1558 }
 0x35f   : > { %v954_v22 = vadd.f32 1.0, %v1559_v21 }
 0x360   : > { %1560 = vrcp.f32 %v947_v20 }
 0x361   : > { %1562 = vrcp.f32 %v954_v22 }
 0x36a   : > { %v1561_v24 = vpop.eup %1560 }
 0x36b   : > { %v958_v25 = vmul.f32 %v1561_v24, %v957_v23  ;;  %v1563_v27 = vpop.eup %1562 }
 0x36c   : > { %v961_v28 = vsub.f32 1.0, %v1563_v27  ;;  %v963_v33 = vmul.f32 %v1563_v27, %v1997_v62 }
 0x36d   : > { %v959_v26 = vadd.f32 %v958_v25, %v1936_v55 }
 0x36f   : > { %1564 = vtanh.f32 %v959_v26 }
 0x379   : > { %v1565_v30 = vpop.eup %1564 }
 0x37a   : > { %v962_v32 = vmul.f32 %v1565_v30, %v961_v28 }
 0x37c   : > { %v964_v50 = vadd.f32 %v963_v33, %v962_v32 }
 0x37e   : > { %v969_v53 = vpack.c.bf16 %v964_v50, %v964_v50 }
 0x380   : > { %1003 = vmatmul.mubr.bf16.vlgmr.msra.gmra.mrb[20].mxu0 %v969_v53  ;;  %1438 = vmatmul.mubr.bf16.vlgmr.msra.gmra.mrb[16].mxu1 %v969_v53 }
 0x381   : > { %1457 = vmatprep.mubr.msk.bf16.mxu0 (!%p1295_p10), %vm1665_vm2, %v1664_v41 }
 0x453   : > { %v1004_v63 = vpop.f32.mrb[20].mxu0  ;;  %v1045_v1 = vpop.f32.mrb[16].mxu1 }
 0x454   : > { %v1051_v2 = vadd.f32 %v1004_v63, %v1938_v57  ;;  %v1006_v4 = vpop.f32.mrb[21].mxu0  ;;  %v1439_v10 = vpop.f32.mrb[17].mxu1  ;;  %v1065_v43 = vadd.f32 %v1949_v39, %v1045_v1  ;;  %v1576_v39 = vld [vmem:[%s2082_s5] sm:$0xff] (!%p1295_p10)  }
 0x455   : > { %v1058_v29 = vadd.f32 %v1006_v4, %v1940_v60  ;;  %v1008_v55 = vpop.f32.mrb[22].mxu0  ;;  %v1048_v48 = vpop.f32.mrb[18].mxu1  ;;  %1442 = vmatpush3.bf16.msra.mxu0 (!%p1295_p10), %v1576_v39 }
 0x456   : > { %v1293_v56 = vmul.f32 -1.442695, %v1051_v2  ;;  %v1009_v12 = vpop.f32.mrb[23].mxu0  ;;  %v1440_v31 = vpop.f32.mrb[19].mxu1  ;;  %1443 = vmatprep.subr.bf16.mxu0 (!%p1295_p10), %v1664_v41 }
 0x457   : > { %v1294_v34 = vmul.f32 -1.442695, %v1058_v29 }
 0x458   : > { %1566 = vpow2.f32 %v1293_v56 }
 0x459   : > { %1568 = vpow2.f32 %v1294_v34 }
 0x462   : > { %v1567_v35 = vpop.eup %1566 }
 0x463   : > { %v1055_v36 = vadd.f32 1.0, %v1567_v35  ;;  %v1569_v37 = vpop.eup %1568 }
 0x464   : > { %v1062_v38 = vadd.f32 1.0, %v1569_v37 }
 0x465   : > { %1570 = vrcp.f32 %v1055_v36 }
 0x466   : > { %1572 = vrcp.f32 %v1062_v38 }
 0x46f   : > { %v1571_v57 = vpop.eup %1570 }
 0x470   : > { %v1066_v44 = vmul.f32 %v1571_v57, %v1065_v43  ;;  %v1573_v46 = vpop.eup %1572 }
 0x471   : > { %v1069_v5 = vsub.f32 1.0, %v1573_v46  ;;  %v1071_v40 = vmul.f32 %v1573_v46, %v964_v50 }
 0x472   : > { %v1067_v60 = vadd.f32 %v1066_v44, %v1942_v61  ;;  %v1577_v61 = vld [vmem:[%s2082_s5 + $0x8] sm:$0xff] (!%p1295_p10)  }
 0x473   : > { %1444 = vmatpush3.bf16.msra.mxu0 (!%p1295_p10), %v1577_v61 }
 0x474   : > { %1574 = vtanh.f32 %v1067_v60  ;;  %1445 = vmatprep.subr.bf16.mxu0 (!%p1295_p10), %v1664_v41 }
 0x477   : > { %1446 = vmatpush3.bf16.msra.mxu0 (!%p1295_p10), %v1578_v47 }
 0x478   : > { %1447 = vmatprep.subr.bf16.mxu0 (!%p1295_p10), %v1664_v41 }
 0x47b   : > { %1448 = vmatpush3.bf16.msra.mxu0 (!%p1295_p10), %v1579_v42 }
 0x47c   : > { %1449 = vmatprep.subr.bf16.mxu0 (!%p1295_p10), %v1664_v41 }
 0x47d   : > { %1077 = sbr.rel (%p1295_p10) target bundleno = 1381 (0x565), region = 64 }
 0x47e   : > { %v1575_v49 = vpop.eup %1574 }
 0x47f   : > { %v1070_v51 = vmul.f32 %v1575_v49, %v1069_v5  ;;  %1450 = vmatpush3.bf16.msra.mxu0 (!%p1295_p10), %v1580_v52 }
 0x480   : > { %1451 = vmatprep.subr.bf16.mxu0 (!%p1295_p10), %v1664_v41 }
 0x481   : > { %v1072_v45 = vadd.f32 %v1071_v40, %v1070_v51 }
 0x483   : > { %1073 = vst [vmem:[#allocation2] sm:$0xff] %v1072_v45  ;;  %1452 = vmatpush3.bf16.msra.mxu0 (!%p1295_p10), %v1581_v54 }
 0x484   : > { %1453 = vmatprep.subr.bf16.mxu0 %v1664_v41 }
 0x487   : > { %1454 = vmatpush3.bf16.msra.mxu0 %v1582_v58 }
 0x488   : > { %1455 = vmatprep.subr.bf16.mxu0 %v1664_v41 }
 0x48a   : > { %v1078_v62 = vld [vmem:[#allocation2] sm:$0xff] }
 0x48b   : > { %v1079_v0 = vpack.c.bf16 %v1078_v62, %v1078_v62  ;;  %1456 = vmatpush3.bf16.msra.mxu0 %v1583_v59 }
 0x48e   : > { %1458 = vmatmul.mubr.bf16.vlgmr.msra.gmra.mrb[0].mxu0 %v1079_v0 }
 0x561   : > { %v1185_v6 = vpop.f32.mrb[0].mxu0 }
 0x562   : > { %v1186_v7 = vadd.f32 %v1296_v3, %v1185_v6  ;;  %v1459_v8 = vpop.f32.mrb[1].mxu0 }
 0x563   : > { %v1188_v9 = vpop.f32.mrb[2].mxu0 }
 0x564   : > { %1191 = vst [vmem:[%s2084_s7] sm:$0xff] %v1186_v7  ;;  %v1460_v11 = vpop.f32.mrb[3].mxu0 }
 0x565 PF: > { %s19_s24 = sadd.s32 1, %s1654_s24  }
 0x566   : > { %p16_p11 = scmp.ge.s32.totalorder %s19_s24, 4  }
 0x568   :  { %18 = sbr.rel (!%p16_p11) target bundleno = 2 (0x2), region = 94 }
 0x56f   :  { %1203 = vsyncpa [#allocation5], 1 }
 0x570   :  { %1205 = vsyncpa [#allocation5 + $0x1], 1 }
 0x571   :  { %1206 = vsyncpa [#allocation7], 1 }

</bundles_post_ra>
